<compile_context>
chip_gen: v6e
topology: v6e:2x2x1
jax: 0.10.0
libtpu: 0.0.40
codegen_flags: <defaults>
</compile_context>

<pallas_src>
import functools

import jax
import jax.numpy as jnp
from jax.experimental import pallas as pl
from jax.experimental.pallas import tpu as pltpu

_LANE = 128


def _round_up(x, m):
    return (x + m - 1) // m * m


def _batch_tile(B: int) -> int:
    """Pick a legal, reasonably large batch tile (<=512 rows)."""
    if B < 8:
        return B                      # full-dim block is always legal
    for tb in (512, 256, 128, 64, 32, 16, 8):
        if tb <= B:
            return tb
    return 8


def _critic_kernel(s_ref, a_ref, w1s_ref, w1a_ref, b1_ref, w2_ref, b2_ref,
                   wq_ref, bq_ref, out_ref, *, use_bf16):
    """One batch tile of the MLP; weights are VMEM-resident padded (lane=128) tiles."""
    mxu = jnp.bfloat16 if use_bf16 else jnp.float32

    s = s_ref[...].astype(mxu)                                        # (TB, D)
    a = a_ref[...].astype(mxu)                                        # (TB, A)

    # fc1 as a split matmul over [state, action] (no concat needed)
    h1 = jnp.dot(s, w1s_ref[...].astype(mxu), preferred_element_type=jnp.float32)
    h1 = h1 + jnp.dot(a, w1a_ref[...].astype(mxu), preferred_element_type=jnp.float32)
    h1 = jnp.maximum(h1 + b1_ref[...], 0.0)                           # f32 bias + relu

    # fc2
    h2 = jnp.dot(h1.astype(mxu), w2_ref[...].astype(mxu),
                 preferred_element_type=jnp.float32)
    h2 = jnp.maximum(h2 + b2_ref[...], 0.0)

    # Q: padded (fc2p, 128) projection -> lane-dense output; q lives in column 0,
    # bias is folded into the padded bias row.
    q = jnp.dot(h2.astype(mxu), wq_ref[...].astype(mxu),
                preferred_element_type=jnp.float32)
    out_ref[...] = (q + bq_ref[...]).astype(out_ref.dtype)            # (TB, 128) full-lane store


@functools.partial(jax.jit, static_argnames=("use_bf16",))
def critic_forward(state, action, params, use_bf16=False):
    """state: (B, input_dims), action: (B, n_actions) -> (B, 1)."""
    w1s, w1a, b1, w2, b2, wq, bq = params
    B, D = state.shape
    A = action.shape[1]

    TB = _batch_tile(B)
    grid = (pl.cdiv(B, TB),)

    # Weights/biases: constant block index -> stay resident in VMEM across grid steps.
    resident = lambda arr: pl.BlockSpec(arr.shape, lambda i: (0, 0))

    out_pad = pl.pallas_call(
        functools.partial(_critic_kernel, use_bf16=use_bf16),
        out_shape=jax.ShapeDtypeStruct((B, _LANE), jnp.float32),
        grid=grid,
        in_specs=[
            pl.BlockSpec((TB, D), lambda i: (i, 0)),      # state tile
            pl.BlockSpec((TB, A), lambda i: (i, 0)),      # action tile
            resident(w1s), resident(w1a), resident(b1),
            resident(w2), resident(b2),
            resident(wq), resident(bq),
        ],
        out_specs=pl.BlockSpec((TB, _LANE), lambda i: (i, 0)),
        compiler_params=pltpu.CompilerParams(
            dimension_semantics=("parallel",)),           # 2-TC sharding on v7x
    )(state, action, w1s, w1a, b1, w2, b2, wq, bq)

    return out_pad[:, :1]                                 # free slice of the lane-dense slab


def init_critic_params(key, input_dims, n_actions, fc1_dims, fc2_dims):
    """nn.Linear default init U(-1/sqrt(fan_in), 1/sqrt(fan_in)).

    Weights are pre-transposed to (fan_in, fan_out) and zero-padded so hidden/output
    widths are multiples of 128 lanes; w1 is split into state / action halves.
    Zero padding is mathematically transparent (relu(0)=0, zero rows/cols contribute 0).
    """
    fc1_p = _round_up(fc1_dims, _LANE)
    fc2_p = _round_up(fc2_dims, _LANE)

    def linear(k, fan_in, fan_out, pad_out):
        kw, kb = jax.random.split(k)
        bound = 1.0 / jnp.sqrt(jnp.float32(fan_in))
        w = jax.random.uniform(kw, (fan_in, fan_out), jnp.float32, -bound, bound)
        b = jax.random.uniform(kb, (1, fan_out), jnp.float32, -bound, bound)
        w = jnp.pad(w, ((0, 0), (0, pad_out - fan_out)))
        b = jnp.pad(b, ((0, 0), (0, pad_out - fan_out)))
        return w, b

    k1, k2, k3 = jax.random.split(key, 3)

    w1, b1 = linear(k1, input_dims + n_actions, fc1_dims, fc1_p)
    w1s, w1a = w1[:input_dims], w1[input_dims:]           # split: no runtime concat

    w2, b2 = linear(k2, fc1_dims, fc2_dims, fc2_p)
    w2 = jnp.pad(w2, ((0, fc1_p - fc1_dims), (0, 0)))     # pad contraction rows

    wq, bq = linear(k3, fc2_dims, 1, _LANE)               # q in column 0, bias folded
    wq = jnp.pad(wq, ((0, fc2_p - fc2_dims), (0, 0)))

    return (w1s, w1a, b1, w2, b2, wq, bq)


def _reference_forward(state, action, params):
    """Pure-JAX reference (same math, same padded params)."""
    w1s, w1a, b1, w2, b2, wq, bq = params
    h1 = jnp.maximum(state @ w1s + action @ w1a + b1, 0.0)
    h2 = jnp.maximum(h1 @ w2 + b2, 0.0)
    return (h2 @ wq + bq)[:, :1]


if __name__ == "__main__":
    # Small shapes consistent with Critic(beta, input_dims=[8], n_actions=4, fc1_dims=32, fc2_dims=32)
    B, INPUT_DIMS, N_ACTIONS, FC1, FC2 = 2, 8, 4, 32, 32

    key = jax.random.PRNGKey(0)
    k_state, k_action, k_params = jax.random.split(key, 3)

    state = jax.random.normal(k_state, (B, INPUT_DIMS), jnp.float32)
    action = jax.random.normal(k_action, (B, N_ACTIONS), jnp.float32)
    params = init_critic_params(k_params, INPUT_DIMS, N_ACTIONS, FC1, FC2)

    q_ref = _reference_forward(state, action, params)

    # f32 path: bit-for-bit-ish against the reference
    q = jax.block_until_ready(critic_forward(state, action, params, use_bf16=False))
    assert q.shape == (B, 1)
    assert jnp.allclose(q, q_ref, atol=1e-5, rtol=1e-5), (q, q_ref)

    # bf16-MXU fast path (v6e/v7x): f32 accumulate, looser tolerance
    q_bf16 = jax.block_until_ready(critic_forward(state, action, params, use_bf16=True))
    assert jnp.allclose(q_bf16, q_ref, atol=5e-2, rtol=5e-2), (q_bf16, q_ref)

    # Larger, non-multiple-of-8 batch exercises the batch grid + partial last block.
    B2 = 300
    k_s2, k_a2 = jax.random.split(jax.random.PRNGKey(1))
    state2 = jax.random.normal(k_s2, (B2, INPUT_DIMS), jnp.float32)
    action2 = jax.random.normal(k_a2, (B2, N_ACTIONS), jnp.float32)
    q2 = jax.block_until_ready(critic_forward(state2, action2, params, use_bf16=False))
    q2_ref = _reference_forward(state2, action2, params)
    assert q2.shape == (B2, 1)
    assert jnp.allclose(q2, q2_ref, atol=1e-5, rtol=1e-5)

    # TODO(synk): optimizer/save/load from the PyTorch module are training/IO concerns,
    # not part of the forward pass, and are intentionally not ported.
    print("KERNEL_OK")
</pallas_src>

<mosaic_0001>
module attributes {stable_mosaic.version = 11 : i64} {
  func.func @_critic_kernel(%arg0: i32, %arg1: memref<2x8xf32, #tpu.memory_space<vmem>>, %arg2: memref<2x4xf32, #tpu.memory_space<vmem>>, %arg3: memref<8x128xf32, #tpu.memory_space<vmem>>, %arg4: memref<4x128xf32, #tpu.memory_space<vmem>>, %arg5: memref<1x128xf32, #tpu.memory_space<vmem>>, %arg6: memref<128x128xf32, #tpu.memory_space<vmem>>, %arg7: memref<1x128xf32, #tpu.memory_space<vmem>>, %arg8: memref<128x128xf32, #tpu.memory_space<vmem>>, %arg9: memref<1x128xf32, #tpu.memory_space<vmem>>, %arg10: memref<2x128xf32, #tpu.memory_space<vmem>>) attributes {dimension_semantics = [#tpu.dimension_semantics<parallel>], iteration_bounds = array<i64: 1>, scalar_prefetch = 0 : i64, scratch_operands = 0 : i64, tpu.core_type = #tpu.core_type<tc>, window_params = [{transform_indices = @transform_0, window_bounds = array<i64: 2, 8>}, {transform_indices = @transform_1, window_bounds = array<i64: 2, 4>}, {pipeline_mode = #tpu.pipeline_mode<synchronous>, transform_indices = @transform_2, window_bounds = array<i64: 8, 128>}, {pipeline_mode = #tpu.pipeline_mode<synchronous>, transform_indices = @transform_3, window_bounds = array<i64: 4, 128>}, {pipeline_mode = #tpu.pipeline_mode<synchronous>, transform_indices = @transform_4, window_bounds = array<i64: 1, 128>}, {pipeline_mode = #tpu.pipeline_mode<synchronous>, transform_indices = @transform_5, window_bounds = array<i64: 128, 128>}, {pipeline_mode = #tpu.pipeline_mode<synchronous>, transform_indices = @transform_6, window_bounds = array<i64: 1, 128>}, {pipeline_mode = #tpu.pipeline_mode<synchronous>, transform_indices = @transform_7, window_bounds = array<i64: 128, 128>}, {pipeline_mode = #tpu.pipeline_mode<synchronous>, transform_indices = @transform_8, window_bounds = array<i64: 1, 128>}, {transform_indices = @transform_9, window_bounds = array<i64: 2, 128>}]} {
    %c0 = arith.constant 0 : index
    %c0_0 = arith.constant 0 : index
    %0 = vector.load %arg1[%c0, %c0_0] : memref<2x8xf32, #tpu.memory_space<vmem>>, vector<2x8xf32>
    %c0_1 = arith.constant 0 : index
    %c0_2 = arith.constant 0 : index
    %1 = vector.load %arg2[%c0_1, %c0_2] : memref<2x4xf32, #tpu.memory_space<vmem>>, vector<2x4xf32>
    %c0_3 = arith.constant 0 : index
    %c0_4 = arith.constant 0 : index
    %2 = vector.load %arg3[%c0_3, %c0_4] : memref<8x128xf32, #tpu.memory_space<vmem>>, vector<8x128xf32>
    %cst = arith.constant dense<0.000000e+00> : vector<2x128xf32>
    %3 = tpu.matmul %0, %2, %cst {dimension_numbers = #tpu.dot_dimension_numbers<[1], [0], [0], [1], [0, 0, 1, 1], [], []>} : vector<2x8xf32>, vector<8x128xf32>, vector<2x128xf32> -> vector<2x128xf32>
    %c0_5 = arith.constant 0 : index
    %c0_6 = arith.constant 0 : index
    %4 = vector.load %arg4[%c0_5, %c0_6] : memref<4x128xf32, #tpu.memory_space<vmem>>, vector<4x128xf32>
    %cst_7 = arith.constant dense<0.000000e+00> : vector<2x128xf32>
    %5 = tpu.matmul %1, %4, %cst_7 {dimension_numbers = #tpu.dot_dimension_numbers<[1], [0], [0], [1], [0, 0, 1, 1], [], []>} : vector<2x4xf32>, vector<4x128xf32>, vector<2x128xf32> -> vector<2x128xf32>
    %6 = arith.addf %3, %5 : vector<2x128xf32>
    %c0_8 = arith.constant 0 : index
    %c0_9 = arith.constant 0 : index
    %7 = vector.load %arg5[%c0_8, %c0_9] : memref<1x128xf32, #tpu.memory_space<vmem>>, vector<1x128xf32>
    %8 = vector.broadcast %7 : vector<1x128xf32> to vector<2x128xf32>
    %9 = arith.addf %6, %8 : vector<2x128xf32>
    %cst_10 = arith.constant 0.000000e+00 : f32
    %10 = vector.broadcast %cst_10 : f32 to vector<2x128xf32>
    %11 = arith.maximumf %9, %10 : vector<2x128xf32>
    %c0_11 = arith.constant 0 : index
    %c0_12 = arith.constant 0 : index
    %12 = vector.load %arg6[%c0_11, %c0_12] : memref<128x128xf32, #tpu.memory_space<vmem>>, vector<128x128xf32>
    %cst_13 = arith.constant dense<0.000000e+00> : vector<2x128xf32>
    %13 = tpu.matmul %11, %12, %cst_13 {dimension_numbers = #tpu.dot_dimension_numbers<[1], [0], [0], [1], [0, 0, 1, 1], [], []>} : vector<2x128xf32>, vector<128x128xf32>, vector<2x128xf32> -> vector<2x128xf32>
    %c0_14 = arith.constant 0 : index
    %c0_15 = arith.constant 0 : index
    %14 = vector.load %arg7[%c0_14, %c0_15] : memref<1x128xf32, #tpu.memory_space<vmem>>, vector<1x128xf32>
    %15 = vector.broadcast %14 : vector<1x128xf32> to vector<2x128xf32>
    %16 = arith.addf %13, %15 : vector<2x128xf32>
    %cst_16 = arith.constant 0.000000e+00 : f32
    %17 = vector.broadcast %cst_16 : f32 to vector<2x128xf32>
    %18 = arith.maximumf %16, %17 : vector<2x128xf32>
    %c0_17 = arith.constant 0 : index
    %c0_18 = arith.constant 0 : index
    %19 = vector.load %arg8[%c0_17, %c0_18] : memref<128x128xf32, #tpu.memory_space<vmem>>, vector<128x128xf32>
    %cst_19 = arith.constant dense<0.000000e+00> : vector<2x128xf32>
    %20 = tpu.matmul %18, %19, %cst_19 {dimension_numbers = #tpu.dot_dimension_numbers<[1], [0], [0], [1], [0, 0, 1, 1], [], []>} : vector<2x128xf32>, vector<128x128xf32>, vector<2x128xf32> -> vector<2x128xf32>
    %c0_20 = arith.constant 0 : index
    %c0_21 = arith.constant 0 : index
    %21 = vector.load %arg9[%c0_20, %c0_21] : memref<1x128xf32, #tpu.memory_space<vmem>>, vector<1x128xf32>
    %22 = vector.broadcast %21 : vector<1x128xf32> to vector<2x128xf32>
    %23 = arith.addf %20, %22 : vector<2x128xf32>
    %c0_22 = arith.constant 0 : index
    %c0_23 = arith.constant 0 : index
    %24 = vector.load %arg10[%c0_22, %c0_23] : memref<2x128xf32, #tpu.memory_space<vmem>>, vector<2x128xf32>
    tpu.vector_store %arg10[%c0_22, %c0_23], %23 {strides = array<i32>} : memref<2x128xf32, #tpu.memory_space<vmem>>, vector<2x128xf32>,
    return
  }
  func.func @transform_0(%arg0: i32) -> (i32, i32) {
    %c0_i32 = arith.constant 0 : i32
    %c0_i32_0 = arith.constant 0 : i32
    return %arg0, %c0_i32 : i32, i32
  }
  func.func @transform_1(%arg0: i32) -> (i32, i32) {
    %c0_i32 = arith.constant 0 : i32
    %c0_i32_0 = arith.constant 0 : i32
    return %arg0, %c0_i32 : i32, i32
  }
  func.func @transform_2(%arg0: i32) -> (i32, i32) {
    %c0_i32 = arith.constant 0 : i32
    %c0_i32_0 = arith.constant 0 : i32
    %c0_i32_1 = arith.constant 0 : i32
    return %c0_i32, %c0_i32_0 : i32, i32
  }
  func.func @transform_3(%arg0: i32) -> (i32, i32) {
    %c0_i32 = arith.constant 0 : i32
    %c0_i32_0 = arith.constant 0 : i32
    %c0_i32_1 = arith.constant 0 : i32
    return %c0_i32, %c0_i32_0 : i32, i32
  }
  func.func @transform_4(%arg0: i32) -> (i32, i32) {
    %c0_i32 = arith.constant 0 : i32
    %c0_i32_0 = arith.constant 0 : i32
    %c0_i32_1 = arith.constant 0 : i32
    return %c0_i32, %c0_i32_0 : i32, i32
  }
  func.func @transform_5(%arg0: i32) -> (i32, i32) {
    %c0_i32 = arith.constant 0 : i32
    %c0_i32_0 = arith.constant 0 : i32
    %c0_i32_1 = arith.constant 0 : i32
    return %c0_i32, %c0_i32_0 : i32, i32
  }
  func.func @transform_6(%arg0: i32) -> (i32, i32) {
    %c0_i32 = arith.constant 0 : i32
    %c0_i32_0 = arith.constant 0 : i32
    %c0_i32_1 = arith.constant 0 : i32
    return %c0_i32, %c0_i32_0 : i32, i32
  }
  func.func @transform_7(%arg0: i32) -> (i32, i32) {
    %c0_i32 = arith.constant 0 : i32
    %c0_i32_0 = arith.constant 0 : i32
    %c0_i32_1 = arith.constant 0 : i32
    return %c0_i32, %c0_i32_0 : i32, i32
  }
  func.func @transform_8(%arg0: i32) -> (i32, i32) {
    %c0_i32 = arith.constant 0 : i32
    %c0_i32_0 = arith.constant 0 : i32
    %c0_i32_1 = arith.constant 0 : i32
    return %c0_i32, %c0_i32_0 : i32, i32
  }
  func.func @transform_9(%arg0: i32) -> (i32, i32) {
    %c0_i32 = arith.constant 0 : i32
    %c0_i32_0 = arith.constant 0 : i32
    return %arg0, %c0_i32 : i32, i32
  }
}

</mosaic_0001>

<bundles_post_ra>
// kernel: critic_forward.1
= control target key start
LH: loop header
LB: loop body
LE: loop exit
PB: predicated region body
PF: predicated region fallthrough
CT: control target
= control target key end

     0   :  { %14 = vsyncpa [#allocation3], 0  ;;  %s830_s0 = inlined_call_operand.hbm [shape: f32[2,8], index: 0, kind: input, shape index: {}]   ;;  %s831_s1 = inlined_call_operand.hbm [shape: f32[2,4], index: 1, kind: input, shape index: {}]   ;;  %s832_s2 = inlined_call_operand.hbm [shape: f32[8,128], index: 2, kind: input, shape index: {}]   ;;  %s833_s3 = inlined_call_operand.vmem [shape: f32[4,128], index: 3, kind: input, shape index: {}]   ;;  %s834_s4 = inlined_call_operand.vmem [shape: f32[1,128], index: 4, kind: input, shape index: {}]   ;;  %s835_s5 = inlined_call_operand.hbm [shape: f32[128,128], index: 5, kind: input, shape index: {}]   ;;  %s836_s6 = inlined_call_operand.vmem [shape: f32[1,128], index: 6, kind: input, shape index: {}]   ;;  %s837_s7 = inlined_call_operand.hbm [shape: f32[128,128], index: 7, kind: input, shape index: {}]   ;;  %s838_s8 = inlined_call_operand.vmem [shape: f32[1,128], index: 8, kind: input, shape index: {}]   ;;  %s839_s9 = inlined_call_operand.vmem [shape: f32[2,128], index: 9, kind: output, shape index: {}]  }
   0x1   :  { %15 = vsyncpa [#allocation5], 0 }
   0x2   :  { %16 = vsyncpa [#allocation8], 0  ;;  %s693_s30 = smov [#allocation4]   ;;  %s694_s11 = smov [#allocation7]  }
   0x3   :  { %s33_s10 = sshll.u32 %s693_s30, 4  ;;  %s56_s12 = sshll.u32 %s694_s11, 4  ;;  %s34_s10 = int_to_ptr.vmem [resolvable:$true] %s33_s10  ;;  %s57_s12 = int_to_ptr.vmem [resolvable:$true] %s56_s12 }
   0x4   :  { %s595_s13 = scalar_lea.vmem %s34_s10, 32  ;;  %p600_p1 = scmp.lt.s32.totalorder %s34_s10, %s34_s10 }
   0x5   :  { %p596_p0 = scmp.ne.s32.totalorder %s34_s10, %s595_s13  ;;  %p601_p2 = scmp.lt.s32.totalorder %s595_s13, %s595_s13 }
   0x7   :  { %p602_p3 = por %p601_p2, %p600_p1 }
   0x9   :  { %p603_p4 = pnand %p602_p3, %p596_p0 }
   0xb   :  { %606 = shalt.err (!%p603_p4)
}
   0xc   :  { %36 = dma.hbm_to_vmem [thread:$0]  %s831_s1, 32, %s34_s10, [#allocation5]  }
   0xd   :  { %s615_s16 = scalar_lea.vmem %s57_s12, 2048  ;;  %p620_p6 = scmp.lt.s32.totalorder %s57_s12, %s57_s12 }
   0xe   :  { %p616_p5 = scmp.ne.s32.totalorder %s57_s12, %s615_s16  ;;  %p621_p7 = scmp.lt.s32.totalorder %s615_s16, %s615_s16 }
  0x10   :  { %p622_p8 = por %p621_p7, %p620_p6 }
  0x12   :  { %p623_p9 = pnand %p622_p8, %p616_p5 }
  0x14   :  { %626 = shalt.err (!%p623_p9)
}
  0x15   :  { %s695_s17 = smov 128   ;;  %s696_s18 = smov 8  }
  0x16   :  { %62 = dma.hbm_to_vmem [thread:$0]  %s835_s5, 2048, %s57_s12, [#allocation8], %s695_s17, %s695_s17, %s696_s18  }
  0x17   :  { %s697_s21 = smov [#allocation2]   ;;  %s698_s23 = smov [#allocation6]  }
  0x18   :  { %s23_s22 = sshll.u32 %s697_s21, 4  ;;  %s43_s1 = sshll.u32 %s698_s23, 4  ;;  %s24_s22 = int_to_ptr.vmem [resolvable:$true] %s23_s22  ;;  %s44_s1 = int_to_ptr.vmem [resolvable:$true] %s43_s1 }
  0x19   :  { %s635_s24 = scalar_lea.vmem %s24_s22, 32  ;;  %p640_p11 = scmp.lt.s32.totalorder %s24_s22, %s24_s22 }
  0x1a   :  { %p636_p10 = scmp.ne.s32.totalorder %s24_s22, %s635_s24  ;;  %p641_p12 = scmp.lt.s32.totalorder %s635_s24, %s635_s24 }
  0x1c   :  { %p642_p13 = por %p641_p12, %p640_p11 }
  0x1e   :  { %p643_p0 = pnand %p642_p13, %p636_p10 }
  0x20   :  { %646 = shalt.err (!%p643_p0)
}
  0x21   :  { %26 = dma.hbm_to_vmem [thread:$0]  %s830_s0, 32, %s24_s22, [#allocation3]  }
  0x22   :  { %s655_s27 = scalar_lea.vmem %s44_s1, 128  ;;  %p660_p2 = scmp.lt.s32.totalorder %s44_s1, %s44_s1 }
  0x23   :  { %p656_p1 = scmp.ne.s32.totalorder %s44_s1, %s655_s27  ;;  %p661_p3 = scmp.lt.s32.totalorder %s655_s27, %s655_s27 }
  0x25   :  { %p662_p4 = por %p661_p3, %p660_p2 }
  0x27   :  { %p663_p5 = pnand %p662_p4, %p656_p1 }
  0x29   :  { %666 = shalt.err (!%p663_p5)
}
  0x2a   :  { %46 = dma.hbm_to_vmem [thread:$0]  %s832_s2, 128, %s44_s1, [#allocation5]  }
  0x2b   :  { %s699_s29 = smov [#allocation9]  }
  0x2c   :  { %s70_s30 = sshll.u32 %s699_s29, 4  ;;  %s71_s30 = int_to_ptr.vmem [resolvable:$true] %s70_s30 }
  0x2d   :  { %s675_s10 = scalar_lea.vmem %s71_s30, 2048  ;;  %p680_p7 = scmp.lt.s32.totalorder %s71_s30, %s71_s30 }
  0x2e   :  { %p676_p6 = scmp.ne.s32.totalorder %s71_s30, %s675_s10  ;;  %p681_p8 = scmp.lt.s32.totalorder %s675_s10, %s675_s10 }
  0x30   :  { %p682_p9 = por %p681_p8, %p680_p7 }
  0x32   :  { %p683_p10 = pnand %p682_p9, %p676_p6 }
  0x34   :  { %686 = shalt.err (!%p683_p10)
}
  0x35   :  { %76 = dma.hbm_to_vmem [thread:$0]  %s837_s7, 2048, %s71_s30, [#allocation8], %s695_s17, %s695_s17, %s696_s18  }
  0x36   :  { %687 = dma.done.wait [#allocation3], 32  }
  0x37   :  { %688 = vsyncadd [#allocation3], 4294967264 }
  0x38   :  { %689 = dma.done.wait [#allocation5], 160  }
  0x39   :  { %690 = vsyncadd [#allocation5], 4294967136 }
  0x3a   :  { %691 = dma.done.wait [#allocation8], 4096  }
  0x3b   :  { %692 = vsyncadd [#allocation8], 4294963200  ;;  %v700_v0 = vmov 0.0   ;;  %vm701_vm0 = vmmov 0   ;;  %vm102_vm1 = vcmask 1043456   ;;  %vm98_vm2 = vcmask 31744  }
  0x3c   :  { %498 = vmatprep.subr.mxu0 %v700_v0  ;;  %503 = vmatprep.subr.mxu1 %v700_v0  ;;  %vm176_vm3 = vcmask 64512   ;;  %v97_v1 = vld [vmem:[%s833_s3] sm:$0xf]  ;;  %v96_v2 = vld [vmem:[#allocation6] sm:$0xff]  ;;  %v272_v7 = vld [vmem:[#allocation7 + $0x68] sm:$0xff] }
  0x3d   :  { %500 = vmatprep.mubr.msk.f32.mxu0 %vm701_vm0, %v700_v0  ;;  %505 = vmatprep.mubr.msk.f32.mxu1 %vm701_vm0, %v700_v0  ;;  %v95_v3 = vld [vmem:[#allocation4] sm:$0x3]  ;;  %v94_v4 = vld [vmem:[#allocation2] sm:$0x3]  ;;  %v274_v5 = vld [vmem:[#allocation7 + $0x78] sm:$0xff] }
  0x3e   :  { %499 = vmatpush3.msk.msra.mxu0 %vm102_vm1, %v97_v1  ;;  %504 = vmatpush3.msra.mxu1 %v96_v2  ;;  %v273_v6 = vld [vmem:[#allocation7 + $0x70] sm:$0xff]  ;;  %v271_v8 = vld [vmem:[#allocation7 + $0x60] sm:$0xff]  ;;  %v270_v9 = vld [vmem:[#allocation7 + $0x58] sm:$0xff] }
  0x3f   :  { %501 = vmatmul.mubr.msk.f32.vlgmr.msra.gmra.mxu0 %vm98_vm2, %v95_v3  ;;  %506 = vmatmul.mubr.msk.f32.vlgmr.msra.gmra.mxu1 %vm176_vm3, %v94_v4  ;;  %v269_v10 = vld [vmem:[#allocation7 + $0x50] sm:$0xff]  ;;  %v268_v11 = vld [vmem:[#allocation7 + $0x48] sm:$0xff]  ;;  %v267_v12 = vld [vmem:[#allocation7 + $0x40] sm:$0xff] }
  0x40   :  { %508 = vmatprep.subr.mxu0 %v700_v0  ;;  %540 = vmatprep.mubr.msk.f32.mxu0 %vm701_vm0, %v700_v0  ;;  %v266_v13 = vld [vmem:[#allocation7 + $0x38] sm:$0xff]  ;;  %v265_v14 = vld [vmem:[#allocation7 + $0x30] sm:$0xff]  ;;  %v264_v15 = vld [vmem:[#allocation7 + $0x28] sm:$0xff] }
  0x41   :  { %509 = vmatpush3.msra.mxu0 %v274_v5  ;;  %543 = vmatprep.subr.mxu1 %v700_v0  ;;  %v263_v16 = vld [vmem:[#allocation7 + $0x20] sm:$0xff]  ;;  %v262_v17 = vld [vmem:[#allocation7 + $0x18] sm:$0xff]  ;;  %v261_v18 = vld [vmem:[#allocation7 + $0x10] sm:$0xff] }
  0x42   :  { %510 = vmatprep.subr.mxu0 %v700_v0  ;;  %575 = vmatprep.mubr.msk.f32.mxu1 %vm701_vm0, %v700_v0  ;;  %v260_v19 = vld [vmem:[#allocation7 + $0x8] sm:$0xff]  ;;  %v259_v20 = vld [vmem:[#allocation7] sm:$0xff]  ;;  %v368_v21 = vld [vmem:[#allocation9 + $0x78] sm:$0xff] }
  0x43   :  { %511 = vmatpush3.msra.mxu0 %v273_v6  ;;  %v367_v22 = vld [vmem:[#allocation9 + $0x70] sm:$0xff]  ;;  %544 = vmatpush3.msra.mxu1 %v368_v21  ;;  %v366_v23 = vld [vmem:[#allocation9 + $0x68] sm:$0xff]  ;;  %v365_v24 = vld [vmem:[#allocation9 + $0x60] sm:$0xff] }
  0x44   :  { %512 = vmatprep.subr.mxu0 %v700_v0  ;;  %545 = vmatprep.subr.mxu1 %v700_v0  ;;  %v364_v25 = vld [vmem:[#allocation9 + $0x58] sm:$0xff]  ;;  %v363_v26 = vld [vmem:[#allocation9 + $0x50] sm:$0xff]  ;;  %v362_v27 = vld [vmem:[#allocation9 + $0x48] sm:$0xff] }
  0x45   :  { %513 = vmatpush3.msra.mxu0 %v272_v7  ;;  %546 = vmatpush3.msra.mxu1 %v367_v22  ;;  %v361_v28 = vld [vmem:[#allocation9 + $0x40] sm:$0xff]  ;;  %v360_v29 = vld [vmem:[#allocation9 + $0x38] sm:$0xff]  ;;  %v359_v30 = vld [vmem:[#allocation9 + $0x30] sm:$0xff] }
  0x46   :  { %514 = vmatprep.subr.mxu0 %v700_v0  ;;  %547 = vmatprep.subr.mxu1 %v700_v0  ;;  %v358_v31 = vld [vmem:[#allocation9 + $0x28] sm:$0xff]  ;;  %v357_v32 = vld [vmem:[#allocation9 + $0x20] sm:$0xff]  ;;  %v356_v33 = vld [vmem:[#allocation9 + $0x18] sm:$0xff] }
  0x47   :  { %515 = vmatpush3.msra.mxu0 %v271_v8  ;;  %548 = vmatpush3.msra.mxu1 %v366_v23  ;;  %v457_v36 = vld [vmem:[%s834_s4] ss:$0 sm:$0xff]  ;;  %v354_v43 = vld [vmem:[#allocation9 + $0x8] sm:$0xff]  ;;  %v353_v44 = vld [vmem:[#allocation9] sm:$0xff] }
  0x48   :  { %516 = vmatprep.subr.mxu0 %v700_v0  ;;  %549 = vmatprep.subr.mxu1 %v700_v0  ;;  %v355_v42 = vld [vmem:[#allocation9 + $0x10] sm:$0xff] }
  0x49   :  { %517 = vmatpush3.msra.mxu0 %v270_v9  ;;  %550 = vmatpush3.msra.mxu1 %v365_v24  ;;  %v458_v45 = vld [vmem:[%s836_s6] ss:$0 sm:$0xff] }
  0x4a   :  { %518 = vmatprep.subr.mxu0 %v700_v0  ;;  %551 = vmatprep.subr.mxu1 %v700_v0  ;;  %v459_v50 = vld [vmem:[%s838_s8] ss:$0 sm:$0xff] }
  0x4b   :  { %519 = vmatpush3.msra.mxu0 %v269_v10  ;;  %552 = vmatpush3.msra.mxu1 %v364_v25 }
  0x4c   :  { %520 = vmatprep.subr.mxu0 %v700_v0  ;;  %553 = vmatprep.subr.mxu1 %v700_v0 }
  0x4d   :  { %521 = vmatpush3.msra.mxu0 %v268_v11  ;;  %554 = vmatpush3.msra.mxu1 %v363_v26 }
  0x4e   :  { %522 = vmatprep.subr.mxu0 %v700_v0  ;;  %555 = vmatprep.subr.mxu1 %v700_v0 }
  0x4f   :  { %523 = vmatpush3.msra.mxu0 %v267_v12  ;;  %556 = vmatpush3.msra.mxu1 %v362_v27 }
  0x50   :  { %524 = vmatprep.subr.mxu0 %v700_v0  ;;  %557 = vmatprep.subr.mxu1 %v700_v0 }
  0x51   :  { %525 = vmatpush3.msra.mxu0 %v266_v13  ;;  %558 = vmatpush3.msra.mxu1 %v361_v28 }
  0x52   :  { %526 = vmatprep.subr.mxu0 %v700_v0  ;;  %559 = vmatprep.subr.mxu1 %v700_v0 }
  0x53   :  { %527 = vmatpush3.msra.mxu0 %v265_v14  ;;  %560 = vmatpush3.msra.mxu1 %v360_v29 }
  0x54   :  { %528 = vmatprep.subr.mxu0 %v700_v0  ;;  %561 = vmatprep.subr.mxu1 %v700_v0 }
  0x55   :  { %529 = vmatpush3.msra.mxu0 %v264_v15  ;;  %562 = vmatpush3.msra.mxu1 %v359_v30 }
  0x56   :  { %530 = vmatprep.subr.mxu0 %v700_v0  ;;  %563 = vmatprep.subr.mxu1 %v700_v0 }
  0x57   :  { %531 = vmatpush3.msra.mxu0 %v263_v16  ;;  %564 = vmatpush3.msra.mxu1 %v358_v31 }
  0x58   :  { %532 = vmatprep.subr.mxu0 %v700_v0  ;;  %565 = vmatprep.subr.mxu1 %v700_v0 }
  0x59   :  { %533 = vmatpush3.msra.mxu0 %v262_v17  ;;  %566 = vmatpush3.msra.mxu1 %v357_v32 }
  0x5a   :  { %534 = vmatprep.subr.mxu0 %v700_v0  ;;  %567 = vmatprep.subr.mxu1 %v700_v0 }
  0x5b   :  { %535 = vmatpush3.msra.mxu0 %v261_v18  ;;  %568 = vmatpush3.msra.mxu1 %v356_v33 }
  0x5c   :  { %536 = vmatprep.subr.mxu0 %v700_v0  ;;  %569 = vmatprep.subr.mxu1 %v700_v0 }
  0x5d   :  { %537 = vmatpush3.msra.mxu0 %v260_v19  ;;  %570 = vmatpush3.msra.mxu1 %v355_v42 }
  0x5e   :  { %538 = vmatprep.subr.mxu0 %v700_v0  ;;  %571 = vmatprep.subr.mxu1 %v700_v0 }
  0x5f   :  { %539 = vmatpush3.msra.mxu0 %v259_v20  ;;  %572 = vmatpush3.msra.mxu1 %v354_v43 }
  0x60   :  { %573 = vmatprep.subr.mxu1 %v700_v0 }
  0x61   :  { %574 = vmatpush3.msra.mxu1 %v353_v44 }
  0xff   :  { %v172_v34 = vpop.f32.mrf.mxu0  ;;  %v246_v35 = vpop.f32.mrf.mxu1 }
 0x100   :  { %v247_v37 = vadd.f32 %v246_v35, %v172_v34 }
 0x101   :  { %v502_v38 = vpop.f32.mrf.mxu0  ;;  %v507_v39 = vpop.f32.mrf.mxu1 }
 0x102   :  { %v257_v40 = vadd.f32 %v457_v36, %v247_v37 }
 0x104   :  { %v258_v41 = vmax.f32 %v257_v40, 0.0 }
 0x106   :  { %541 = vmatmul.mubr.f32.vlgmr.msra.gmra.mxu0 %v258_v41 }
 0x1c6   :  { %v348_v46 = vpop.f32.mrf.mxu0 }
 0x1c7   :  { %v349_v47 = vadd.f32 %v458_v45, %v348_v46 }
 0x1c8   :  { %v542_v48 = vpop.f32.mrf.mxu0 }
 0x1c9   :  { %v352_v49 = vmax.f32 %v349_v47, 0.0 }
 0x1cb   :  { %576 = vmatmul.mubr.f32.vlgmr.msra.gmra.mxu1 %v352_v49 }
 0x28b   :  { %v442_v51 = vpop.f32.mrf.mxu1 }
 0x28c   :  { %v443_v52 = vadd.f32 %v459_v50, %v442_v51 }
 0x28d   :  { %v577_v53 = vpop.f32.mrf.mxu1 }
 0x28e   :  { %446 = vst [vmem:[%s839_s9] sm:$0x3] %v443_v52 }
 0x28f   :  { %451 = vsyncpa [#allocation3], 1 }
 0x290   :  { %452 = vsyncpa [#allocation5], 1 }
 0x291   :  { %453 = vsyncpa [#allocation8], 1 }

</bundles_post_ra>
